<compile_context>
chip_gen: v6e
topology: v6e:2x2x1
jax: 0.10.0
libtpu: 0.0.40
codegen_flags: <defaults>
</compile_context>

<pallas_src>
import functools
import math

import jax
import jax.numpy as jnp
from jax import lax
from jax.experimental import pallas as pl
from jax.experimental.pallas import tpu as pltpu

_LANE = 128
_SUB = 8
_MAX_TILE_ROWS = 4096  # 4096 * 128 * 4 B = 2 MiB f32 per input tile


def _round_up(x, m):
    return ((x + m - 1) // m) * m


def _sublane_multiple(dtype):
    # f32 -> 8, bf16/f16 -> 16, int8/uint8/bool -> 32 (packed-sublane tiling).
    return max(_SUB, 32 // jnp.dtype(dtype).itemsize)


def _iou_kernel(p_ref, t_ref, tp_ref, sm_ref, *, num_k, tile_elems, n_valid):
    k = pl.program_id(2)

    @pl.when(k == 0)
    def _():
        tp_ref[...] = jnp.zeros_like(tp_ref)
        sm_ref[...] = jnp.zeros_like(sm_ref)

    pred = jax.nn.sigmoid(p_ref[0].astype(jnp.float32))  # (tile_rows, 128)
    tgt = t_ref[0].astype(jnp.float32)

    if n_valid is not None:
        # Element-granularity tail mask: covers the sub-128 lane tail, the
        # <row_mult rows of wrapper padding and any out-of-bounds rows of the
        # (possibly clamped) boundary block.  Pure VPU work with huge slack.
        t_idx = pl.program_id(1) * num_k + k
        row = lax.broadcasted_iota(jnp.int32, pred.shape, 0)
        lane = lax.broadcasted_iota(jnp.int32, pred.shape, 1)
        keep = (row * _LANE + lane) < (n_valid - t_idx * tile_elems)
        pred = jnp.where(keep, pred, 0.0)
        tgt = jnp.where(keep, tgt, 0.0)

    rows = pred.shape[0]
    # (tile_rows,128) -> (tile_rows//8, 8, 128) is a pure regrouping of vregs
    # (no lane/sublane movement); the axis-0 sum is a chain of VPU adds straight
    # into the k-resident (8,128) output accumulator blocks.
    tp = (tgt * pred).reshape(rows // _SUB, _SUB, _LANE)
    sm = (tgt + pred).reshape(rows // _SUB, _SUB, _LANE)
    tp_ref[0, 0] = tp_ref[0, 0] + jnp.sum(tp, axis=0)
    sm_ref[0, 0] = sm_ref[0, 0] + jnp.sum(sm, axis=0)


def iou_loss(pred, target):
    """Equivalent of IOU().forward(pred, target) from the PyTorch module."""
    assert pred.shape == target.shape
    B = pred.shape[0]
    n = math.prod(pred.shape[1:])

    row_mult = max(_sublane_multiple(pred.dtype), _sublane_multiple(target.dtype))
    group = _LANE * row_mult

    p_flat = pred.reshape(B, n)
    t_flat = target.reshape(B, n)
    n_pad = _round_up(n, group)
    if n_pad > n:
        # Tiny pad (< one sublane-group per batch element) just to make the
        # lane-dense reshape legal; pad values are irrelevant (masked in-kernel).
        # TODO(synk): a manual ragged DMA (memory_space=pl.ANY) could avoid even
        #             this copy for non-128-multiple sizes.
        p_flat = jnp.pad(p_flat, ((0, 0), (0, n_pad - n)))
        t_flat = jnp.pad(t_flat, ((0, 0), (0, n_pad - n)))
    rows = n_pad // _LANE
    p3 = p_flat.reshape(B, rows, _LANE)
    t3 = t_flat.reshape(B, rows, _LANE)

    # Balanced tiling: no dead full tiles, tile_rows as large as possible.
    tiles_needed = max(1, pl.cdiv(rows, _MAX_TILE_ROWS))
    # Split odd batches (incl. B == 1) into two parallel super-chunks so both
    # v7x TensorCores get work; harmless on single-TC v5e/v6e.
    splits = 2 if (B % 2 == 1 and rows >= 2 * row_mult) else 1
    tiles = _round_up(tiles_needed, splits)
    num_k = tiles // splits
    tile_rows = _round_up(pl.cdiv(rows, tiles), row_mult)
    tile_elems = tile_rows * _LANE
    needs_mask = tiles * tile_elems > n

    if needs_mask:
        # Clamp so no block is ever fully out of bounds; its contribution is
        # zeroed by the in-kernel element mask anyway.
        last_blk = pl.cdiv(rows, tile_rows) - 1

        def in_map(b, s, k):
            return (b, jnp.minimum(s * num_k + k, last_blk), 0)
    else:

        def in_map(b, s, k):
            return (b, s * num_k + k, 0)

    def out_map(b, s, k):
        return (b, s, 0, 0)

    kernel = functools.partial(
        _iou_kernel,
        num_k=num_k,
        tile_elems=tile_elems,
        n_valid=n if needs_mask else None,
    )

    tp_part, sm_part = pl.pallas_call(
        kernel,
        out_shape=(
            jax.ShapeDtypeStruct((B, splits, _SUB, _LANE), jnp.float32),
            jax.ShapeDtypeStruct((B, splits, _SUB, _LANE), jnp.float32),
        ),
        grid=(B, splits, num_k),
        in_specs=[
            pl.BlockSpec((1, tile_rows, _LANE), in_map),
            pl.BlockSpec((1, tile_rows, _LANE), in_map),
        ],
        out_specs=(
            pl.BlockSpec((1, 1, _SUB, _LANE), out_map),
            pl.BlockSpec((1, 1, _SUB, _LANE), out_map),
        ),
        compiler_params=pltpu.CompilerParams(
            # Batch and super-chunk axes are embarrassingly parallel (both TCs
            # on v7x); the inner reduction axis carries the output accumulators.
            dimension_semantics=("parallel", "parallel", "arbitrary"),
            # 2 inputs x 2 pipeline buffers x 2 MiB tiles ~= 8 MiB + outputs;
            # 32 MiB leaves headroom on every generation (v7x: 64 MiB physical).
            vmem_limit_bytes=32 * 1024 * 1024,
        ),
    )(p3, t3)

    iand = jnp.sum(tp_part, axis=(1, 2, 3))            # (B,)
    ior = jnp.sum(sm_part, axis=(1, 2, 3)) - iand      # (B,)
    # Note: ior == 0 yields NaN, matching the PyTorch reference behavior.
    return jnp.mean(1.0 - iand / ior)


def _iou_ref(pred, target):
    # Pure-JAX reference mirroring the PyTorch _iou loop.
    pred = jax.nn.sigmoid(pred.astype(jnp.float32))
    target = target.astype(jnp.float32)
    axes = tuple(range(1, pred.ndim))
    iand = jnp.sum(target * pred, axis=axes)
    ior = jnp.sum(target, axis=axes) + jnp.sum(pred, axis=axes) - iand
    return jnp.mean(1.0 - iand / ior)


if __name__ == "__main__":
    key = jax.random.PRNGKey(0)

    cases = [
        ((2, 4, 16, 16), jnp.float32),   # even B, exact 1024-multiple: no pad, no mask
        ((1, 4, 32, 32), jnp.float32),   # B=1: reduction split across 2 parallel chunks
        ((3, 3, 10, 10), jnp.float32),   # ragged C*H*W=300: in-kernel tail mask path
        ((2, 4, 16, 16), jnp.bfloat16),  # bf16 inputs: halved HBM traffic path
    ]
    for idx, (shape, dtype) in enumerate(cases):
        k1, k2 = jax.random.split(jax.random.fold_in(key, idx))
        pred = jax.random.normal(k1, shape, dtype=jnp.float32).astype(dtype)
        target = (jax.random.uniform(k2, shape) > 0.5).astype(dtype)

        loss = jax.block_until_ready(iou_loss(pred, target))
        ref = jax.block_until_ready(_iou_ref(pred, target))
        assert jnp.allclose(loss, ref, atol=2e-5, rtol=2e-5), (shape, dtype, loss, ref)

    print("KERNEL_OK")
</pallas_src>

<mosaic_0001>
module attributes {stable_mosaic.version = 11 : i64} {
  func.func @_iou_kernel(%arg0: i32, %arg1: i32, %arg2: i32, %arg3: memref<1x8x128xf32, #tpu.memory_space<vmem>>, %arg4: memref<1x8x128xf32, #tpu.memory_space<vmem>>, %arg5: memref<1x1x8x128xf32, #tpu.memory_space<vmem>>, %arg6: memref<1x1x8x128xf32, #tpu.memory_space<vmem>>) attributes {dimension_semantics = [#tpu.dimension_semantics<parallel>, #tpu.dimension_semantics<parallel>, #tpu.dimension_semantics<arbitrary>], iteration_bounds = array<i64: 2, 1, 1>, scalar_prefetch = 0 : i64, scratch_operands = 0 : i64, tpu.core_type = #tpu.core_type<tc>, window_params = [{transform_indices = @transform_0, window_bounds = array<i64: 1, 8, 128>}, {transform_indices = @transform_1, window_bounds = array<i64: 1, 8, 128>}, {transform_indices = @transform_2, window_bounds = array<i64: 1, 1, 8, 128>}, {transform_indices = @transform_3, window_bounds = array<i64: 1, 1, 8, 128>}]} {
    %c0_i32 = arith.constant 0 : i32
    %0 = arith.cmpi eq, %arg2, %c0_i32 : i32
    %1 = arith.extui %0 : i1 to i32
    %c0_i32_0 = arith.constant 0 : i32
    %2 = arith.cmpi ne, %1, %c0_i32_0 : i32
    scf.if %2 {
      %cst_24 = arith.constant 0.000000e+00 : f32
      %30 = vector.broadcast %cst_24 : f32 to vector<1x1x8x128xf32>
      %c0_25 = arith.constant 0 : index
      %c0_26 = arith.constant 0 : index
      %c0_27 = arith.constant 0 : index
      %c0_28 = arith.constant 0 : index
      %31 = vector.load %arg5[%c0_25, %c0_26, %c0_27, %c0_28] : memref<1x1x8x128xf32, #tpu.memory_space<vmem>>, vector<1x1x8x128xf32>
      tpu.vector_store %arg5[%c0_25, %c0_26, %c0_27, %c0_28], %30 {strides = array<i32>} : memref<1x1x8x128xf32, #tpu.memory_space<vmem>>, vector<1x1x8x128xf32>,
      %cst_29 = arith.constant 0.000000e+00 : f32
      %32 = vector.broadcast %cst_29 : f32 to vector<1x1x8x128xf32>
      %c0_30 = arith.constant 0 : index
      %c0_31 = arith.constant 0 : index
      %c0_32 = arith.constant 0 : index
      %c0_33 = arith.constant 0 : index
      %33 = vector.load %arg6[%c0_30, %c0_31, %c0_32, %c0_33] : memref<1x1x8x128xf32, #tpu.memory_space<vmem>>, vector<1x1x8x128xf32>
      tpu.vector_store %arg6[%c0_30, %c0_31, %c0_32, %c0_33], %32 {strides = array<i32>} : memref<1x1x8x128xf32, #tpu.memory_space<vmem>>, vector<1x1x8x128xf32>,
    } else {
    }
    %c0 = arith.constant 0 : index
    %c0_1 = arith.constant 0 : index
    %c0_2 = arith.constant 0 : index
    %3 = vector.load %arg3[%c0, %c0_1, %c0_2] : memref<1x8x128xf32, #tpu.memory_space<vmem>>, vector<1x8x128xf32>
    %4 = vector.shape_cast %3 : vector<1x8x128xf32> to vector<8x128xf32>
    %5 = arith.negf %4 : vector<8x128xf32>
    %6 = math.exp %5 : vector<8x128xf32>
    %cst = arith.constant 1.000000e+00 : f32
    %7 = vector.broadcast %cst : f32 to vector<8x128xf32>
    %8 = arith.addf %7, %6 : vector<8x128xf32>
    %9 = arith.divf %7, %8 : vector<8x128xf32>
    %c0_3 = arith.constant 0 : index
    %c0_4 = arith.constant 0 : index
    %c0_5 = arith.constant 0 : index
    %10 = vector.load %arg4[%c0_3, %c0_4, %c0_5] : memref<1x8x128xf32, #tpu.memory_space<vmem>>, vector<1x8x128xf32>
    %11 = vector.shape_cast %10 : vector<1x8x128xf32> to vector<8x128xf32>
    %12 = arith.mulf %11, %9 : vector<8x128xf32>
    %13 = vector.shape_cast %12 : vector<8x128xf32> to vector<1x8x128xf32>
    %14 = arith.addf %11, %9 : vector<8x128xf32>
    %15 = vector.shape_cast %14 : vector<8x128xf32> to vector<1x8x128xf32>
    %c0_6 = arith.constant 0 : index
    %c0_7 = arith.constant 0 : index
    %c0_8 = arith.constant 0 : index
    %c0_9 = arith.constant 0 : index
    %16 = vector.load %arg5[%c0_6, %c0_7, %c0_8, %c0_9] : memref<1x1x8x128xf32, #tpu.memory_space<vmem>>, vector<1x1x8x128xf32>
    %17 = vector.shape_cast %16 : vector<1x1x8x128xf32> to vector<8x128xf32>
    %cst_10 = arith.constant dense<0.000000e+00> : vector<8x128xf32>
    %18 = vector.multi_reduction <add>, %13, %cst_10 [0] : vector<1x8x128xf32> to vector<8x128xf32>
    %19 = arith.addf %17, %18 : vector<8x128xf32>
    %c0_11 = arith.constant 0 : index
    %c0_12 = arith.constant 0 : index
    %c0_13 = arith.constant 0 : index
    %c0_14 = arith.constant 0 : index
    %20 = vector.load %arg5[%c0_11, %c0_12, %c0_13, %c0_14] : memref<1x1x8x128xf32, #tpu.memory_space<vmem>>, vector<1x1x8x128xf32>
    %21 = vector.shape_cast %20 : vector<1x1x8x128xf32> to vector<8x128xf32>
    %22 = vector.shape_cast %19 : vector<8x128xf32> to vector<1x1x8x128xf32>
    tpu.vector_store %arg5[%c0_11, %c0_12, %c0_13, %c0_14], %22 {strides = array<i32>} : memref<1x1x8x128xf32, #tpu.memory_space<vmem>>, vector<1x1x8x128xf32>,
    %c0_15 = arith.constant 0 : index
    %c0_16 = arith.constant 0 : index
    %c0_17 = arith.constant 0 : index
    %c0_18 = arith.constant 0 : index
    %23 = vector.load %arg6[%c0_15, %c0_16, %c0_17, %c0_18] : memref<1x1x8x128xf32, #tpu.memory_space<vmem>>, vector<1x1x8x128xf32>
    %24 = vector.shape_cast %23 : vector<1x1x8x128xf32> to vector<8x128xf32>
    %cst_19 = arith.constant dense<0.000000e+00> : vector<8x128xf32>
    %25 = vector.multi_reduction <add>, %15, %cst_19 [0] : vector<1x8x128xf32> to vector<8x128xf32>
    %26 = arith.addf %24, %25 : vector<8x128xf32>
    %c0_20 = arith.constant 0 : index
    %c0_21 = arith.constant 0 : index
    %c0_22 = arith.constant 0 : index
    %c0_23 = arith.constant 0 : index
    %27 = vector.load %arg6[%c0_20, %c0_21, %c0_22, %c0_23] : memref<1x1x8x128xf32, #tpu.memory_space<vmem>>, vector<1x1x8x128xf32>
    %28 = vector.shape_cast %27 : vector<1x1x8x128xf32> to vector<8x128xf32>
    %29 = vector.shape_cast %26 : vector<8x128xf32> to vector<1x1x8x128xf32>
    tpu.vector_store %arg6[%c0_20, %c0_21, %c0_22, %c0_23], %29 {strides = array<i32>} : memref<1x1x8x128xf32, #tpu.memory_space<vmem>>, vector<1x1x8x128xf32>,
    return
  }
  func.func @transform_0(%arg0: i32, %arg1: i32, %arg2: i32) -> (i32, i32, i32) {
    %c1_i32 = arith.constant 1 : i32
    %0 = arith.muli %arg1, %c1_i32 : i32
    %1 = arith.addi %0, %arg2 : i32
    %c0_i32 = arith.constant 0 : i32
    %c0_i32_0 = arith.constant 0 : i32
    return %arg0, %1, %c0_i32 : i32, i32, i32
  }
  func.func @transform_1(%arg0: i32, %arg1: i32, %arg2: i32) -> (i32, i32, i32) {
    %c1_i32 = arith.constant 1 : i32
    %0 = arith.muli %arg1, %c1_i32 : i32
    %1 = arith.addi %0, %arg2 : i32
    %c0_i32 = arith.constant 0 : i32
    %c0_i32_0 = arith.constant 0 : i32
    return %arg0, %1, %c0_i32 : i32, i32, i32
  }
  func.func @transform_2(%arg0: i32, %arg1: i32, %arg2: i32) -> (i32, i32, i32, i32) {
    %c0_i32 = arith.constant 0 : i32
    %c0_i32_0 = arith.constant 0 : i32
    %c0_i32_1 = arith.constant 0 : i32
    return %arg0, %arg1, %c0_i32, %c0_i32_0 : i32, i32, i32, i32
  }
  func.func @transform_3(%arg0: i32, %arg1: i32, %arg2: i32) -> (i32, i32, i32, i32) {
    %c0_i32 = arith.constant 0 : i32
    %c0_i32_0 = arith.constant 0 : i32
    %c0_i32_1 = arith.constant 0 : i32
    return %arg0, %arg1, %c0_i32, %c0_i32_0 : i32, i32, i32, i32
  }
}

</mosaic_0001>

<bundles_post_ra>
// kernel: tpu_custom_call.1
= control target key start
LH: loop header
LB: loop body
LE: loop exit
PB: predicated region body
PF: predicated region fallthrough
CT: control target
= control target key end

     0   :  { %9 = vsyncpa [#allocation3], 0  ;;  %s971_s0 = inlined_call_operand.hbm [shape: f32[2,8,128], index: 0, kind: input, shape index: {}]   ;;  %s972_s1 = inlined_call_operand.hbm [shape: f32[2,8,128], index: 1, kind: input, shape index: {}]   ;;  %s973_s2 = inlined_call_operand.hbm [shape: f32[2,1,8,128], index: 2, kind: output, shape index: {0}]   ;;  %s974_s3 = inlined_call_operand.hbm [shape: f32[2,1,8,128], index: 3, kind: output, shape index: {1}]  }
   0x1   :  { %11 = vsyncpa [#allocation3 + $0x1], 0 }
   0x2   :  { %12 = vsyncpa [#allocation6], 0 }
   0x3   :  { %14 = vsyncpa [#allocation6 + $0x1], 0 }
   0x4   :  { %15 = vsyncpa [#allocation4], 0 }
   0x5   :  { %17 = vsyncpa [#allocation4 + $0x1], 0 }
   0x6   :  { %18 = vsyncpa [#allocation9], 0 }
   0x7   :  { %20 = vsyncpa [#allocation9 + $0x1], 0  ;;  %s764_s12 = smov 0   ;;  %s766_s13 = smov 0  }
   0x8   :  { %s768_s14 = smov 0   ;;  %s770_s15 = smov 0  }
   0x9   :  { %s772_s16 = smov 0   ;;  %s774_s17 = smov 0  }
   0xa LB: > { %s471_s18 = sadd.s32 4294967295, %s738_s17   ;;  %s472_s19 = sadd.s32 4294967294, %s738_s17   ;;  %s738_s17 = sphi %s774_s17, %s26_s17   ;;  %s734_s16 = sphi %s772_s16, %s986_s16   ;;  %s730_s15 = sphi %s770_s15, %s985_s15   ;;  %s726_s14 = sphi %s768_s14, %s984_s14   ;;  %s722_s13 = sphi %s766_s13, %s983_s13   ;;  %s718_s12 = sphi %s764_s12, %s982_s12  }
   0xb   : > { %s45_s20 = sadd.s32 1, %s734_s16  ;;  %s56_s21 = sadd.s32 1, %s726_s14 }
   0xc   : > { %p47_p0 = scmp.ge.s32.totalorder %s45_s20, 2  ;;  %p63_p1 = scmp.ne.s32.totalorder %s726_s14, %s722_s13 }
   0xd   : > { %p64_p2 = scmp.eq.s32.totalorder %s738_s17, 0  ;;  %p69_p3 = scmp.ne.s32.totalorder %s722_s13, %s718_s12 }
   0xe   : > { %s988_s20 = smov (%p47_p0, %s45_s20), 0  ;;  %p70_p5 = scmp.eq.s32.totalorder %s471_s18, 0 }
   0xf   : > { %p805_p4 = por %p64_p2, %p63_p1  ;;  %s51_s23 = ssub.s32 %s734_s16, %s988_s20 }
  0x10   : > { %p125_p6 = scmp.eq.s32.totalorder %s471_s18, 1  ;;  %p54_p7 = scmp.eq.s32.totalorder %s51_s23, 0 }
  0x11   : > { %p811_p8 = por %p70_p5, %p69_p3  ;;  %p131_p10 = scmp.eq.s32.totalorder %s472_s19, 1 }
  0x12   : > { %p815_p9 = por %p125_p6, %p63_p1  ;;  %p513_p13 = scmp.lt.s32.totalorder %s738_s17, 2 }
  0x13   : > { %s820_s26 = scalar_select %p54_p7, %s726_s14, %s56_s21  }
  0x14   : > { %p822_p11 = por %p131_p10, %p69_p3  ;;  %s829_s28 = sand.u32 1, %s726_s14  }
  0x15   : > { %s475_s29 = sshll.u32 %s829_s28, 3  ;;  %s476_s30 = sshll.u32 %s734_s16, 7 }
  0x16   : > { %s190_s6 = scalar_lea.hbm %s971_s0, %s476_s30  ;;  %s183_s7 = scalar_lea.vmem [#allocation2], %s475_s29 }
  0x17   : > { %s192_s8 = sshll.u32 %s183_s7, 4  ;;  %p838_p0 = pnand %p513_p13, %p805_p4  ;;  %s193_s8 = int_to_ptr.vmem [resolvable:$true] %s192_s8 }
  0x18   : > { %p479_p1 = scmp.ge.s32.totalorder %s738_s17, 1  ;;  %p217_p2 = scmp.lt.s32.totalorder %s738_s17, 3 }
  0x19   : > { %s180_s10 = scalar_lea.sflag [#allocation3], %s829_s28  ;;  %p570_p3 = pneg %p838_p0 }
  0x1a   : > { %s581_s11 = scalar_lea.vmem %s193_s8, 128  ;;  %s740_s18 = smov [#allocation2]  }
  0x1b   : > { %p582_p5 = scmp.ne.s32.totalorder %s193_s8, %s581_s11  ;;  %s586_s19 = sshll.u32 %s740_s18, 4  ;;  %s587_s19 = int_to_ptr.vmem [resolvable:$false] %s586_s19 }
  0x1c   : > { %s588_s21 = scalar_lea.vmem %s587_s19, 256  ;;  %p589_p4 = scmp.lt.s32.totalorder %s193_s8, %s587_s19 }
  0x1d   : > { %p584_p6 = pnand %p582_p5, %p570_p3  ;;  %p590_p10 = scmp.lt.s32.totalorder %s588_s21, %s581_s11 }
  0x1f   : > { %p585_p7 = pneg %p584_p6  ;;  %p591_p13 = por %p590_p10, %p589_p4 }
  0x21   : > { %p592_p12 = pnand %p591_p13, %p585_p7 }
  0x23   : > { %595 = shalt.err (!%p592_p12)
}
  0x24   : > { %502 = dma.hbm_to_vmem [thread:$0]  (!%p838_p0), %s190_s6, 128, %s193_s8, %s180_s10  }
  0x25   : > { %p856_p5 = pnand %p479_p1, %p217_p2  ;;  %s210_s5 = scalar_lea.hbm %s972_s1, %s476_s30 }
  0x26   : > { %s203_s7 = scalar_lea.vmem [#allocation5], %s475_s29  ;;  %s200_s18 = scalar_lea.sflag [#allocation6], %s829_s28 }
  0x27   : > { %s212_s11 = sshll.u32 %s203_s7, 4  ;;  %s741_s6 = smov [#allocation5]   ;;  %s213_s11 = int_to_ptr.vmem [resolvable:$true] %s212_s11 }
  0x28   : > { %s609_s19 = scalar_lea.vmem %s213_s11, 128  ;;  %s614_s8 = sshll.u32 %s741_s6, 4  ;;  %s615_s8 = int_to_ptr.vmem [resolvable:$false] %s614_s8 }
  0x29   : > { %p610_p12 = scmp.ne.s32.totalorder %s213_s11, %s609_s19  ;;  %s616_s10 = scalar_lea.vmem %s615_s8, 256 }
  0x2a   : > { %p617_p1 = scmp.lt.s32.totalorder %s213_s11, %s615_s8  ;;  %p618_p2 = scmp.lt.s32.totalorder %s616_s10, %s609_s19 }
  0x2b   : > { %p612_p6 = pnand %p610_p12, %p570_p3 }
  0x2c   : > { %p619_p4 = por %p618_p2, %p617_p1 }
  0x2d   : > { %p613_p7 = pneg %p612_p6 }
  0x2f   : > { %p620_p10 = pnand %p619_p4, %p613_p7 }
  0x31   : > { %623 = shalt.err (!%p620_p10)
}
  0x32   : > { %505 = dma.hbm_to_vmem [thread:$0]  (!%p838_p0), %s210_s5, 128, %s213_s11, %s200_s18  }
  0x33   : > { %221 = sbr.rel (%p856_p5) target bundleno = 129 (0x81), region = 28  ;;  %s872_s28 = sand.u32 (!%p856_p5), 1, %s722_s13  }
  0x34   : > { %s875_s29 = sshll.u32 (!%p856_p5), %s872_s28, 3  ;;  %s224_s30 = scalar_lea.sflag (!%p856_p5), [#allocation3], %s872_s28 }
  0x35   : > { %s227_s21 = scalar_lea.vmem (!%p856_p5), [#allocation2], %s875_s29 }
  0x38   : > { %701 = dma.done.wait (%p811_p8), %s224_s30, 128  }
  0x39   : > { %703 = vsyncadd (%p811_p8), %s224_s30, 4294967168  ;;  %s233_s9 = scalar_lea.sflag [#allocation6], %s872_s28  ;;  %s236_s22 = scalar_lea.vmem [#allocation5], %s875_s29 }
  0x3a   : > { %705 = dma.done.wait (%p811_p8), %s233_s9, 128  }
  0x3b   : > { %707 = vsyncadd (%p811_p8), %s233_s9, 4294967168  ;;  %v277_v0 = vld [vmem:[%s227_s21] sm:$0xff]  ;;  %v284_v4 = vld [vmem:[%s236_s22] sm:$0xff]  ;;  %s487_s23 = sshll.u32 %s730_s15, 7  ;;  %s261_s4 = scalar_lea.vmem [#allocation7], %s875_s29 }
  0x3c   : > { %v484_v1 = vmul.f32 -1.442695, %v277_v0  ;;  %s315_s5 = sshll.u32 %s261_s4, 4  ;;  %s268_s24 = scalar_lea.vmem [#allocation8], %s875_s29  ;;  %s897_s5 = int_to_ptr.vmem [resolvable:$true] %s315_s5 }
  0x3d   : > { %s329_s7 = sshll.u32 %s268_s24, 4  ;;  %s895_s19 = scalar_lea.hbm %s973_s2, %s487_s23  ;;  %s904_s7 = int_to_ptr.vmem [resolvable:$true] %s329_s7 }
  0x3e   : > { %564 = vpow2.f32 %v484_v1  ;;  %s902_s15 = scalar_lea.hbm %s974_s3, %s487_s23  ;;  %s296_s10 = scalar_lea.sflag [#allocation4], %s872_s28 }
  0x3f   : > { %s624_s29 = scalar_lea.vmem %s897_s5, 128  ;;  %s742_s30 = smov [#allocation7]  }
  0x40   : > { %p625_p8 = scmp.ne.s32.totalorder %s897_s5, %s624_s29  ;;  %s628_s21 = sshll.u32 %s742_s30, 4  ;;  %s629_s21 = int_to_ptr.vmem [resolvable:$false] %s628_s21 }
  0x41   : > { %s630_s9 = scalar_lea.vmem %s629_s21, 256  ;;  %p631_p13 = scmp.lt.s32.totalorder %s897_s5, %s629_s21 }
  0x42   : > { %p626_p0 = pnand %p625_p8, %p815_p9  ;;  %p632_p5 = scmp.lt.s32.totalorder %s630_s9, %s624_s29 }
  0x44   : > { %p627_p3 = pneg %p626_p0  ;;  %p633_p12 = por %p632_p5, %p631_p13 }
  0x46   : > { %p634_p6 = pnand %p633_p12, %p627_p3 }
  0x4b   : > { %v565_v2 = vpop.eup %564 }
  0x4c   : > { %v281_v3 = vadd.f32 1.0, %v565_v2 }
  0x4e   : > { %566 = vrcp.f32 %v281_v3 }
  0x5b   : > { %v567_v5 = vpop.eup %566 }
  0x5c   : > { %v285_v6 = vmul.f32 %v567_v5, %v284_v4  ;;  %v286_v7 = vadd.f32 %v567_v5, %v284_v4 }
  0x5e   : > { %290 = vst [vmem:[%s261_s4] sm:$0xff] %v285_v6  ;;  %294 = vst [vmem:[%s268_s24] sm:$0xff] %v286_v7 }
  0x5f   : > { %637 = shalt.err (!%p634_p6)
}
  0x60   : > { %s638_s22 = scalar_lea.hbm %s895_s19, 128  ;;  %s642_s24 = scalar_lea.hbm %s973_s2, 256 }
  0x61   : > { %p639_p7 = scmp.ne.s32.totalorder %s895_s19, %s638_s22  ;;  %p643_p4 = scmp.lt.s32.totalorder %s895_s19, %s973_s2 }
  0x62   : > { %p644_p10 = scmp.lt.s32.totalorder %s642_s24, %s638_s22 }
  0x63   : > { %p640_p1 = pnand %p639_p7, %p815_p9 }
  0x64   : > { %p645_p8 = por %p644_p10, %p643_p4 }
  0x65   : > { %p641_p2 = pneg %p640_p1 }
  0x67   : > { %p646_p0 = pnand %p645_p8, %p641_p2 }
  0x69   : > { %649 = shalt.err (!%p646_p0)
}
  0x6a   : > { %495 = dma.vmem_to_hbm [thread:$0]  (%p815_p9), %s897_s5, 128, %s895_s19, %s296_s10  }
  0x6b   : > { %s301_s6 = scalar_lea.sflag [#allocation9], %s872_s28  ;;  %s650_s8 = scalar_lea.vmem %s904_s7, 128 }
  0x6c   : > { %p651_p3 = scmp.ne.s32.totalorder %s904_s7, %s650_s8  ;;  %s743_s29 = smov [#allocation8]  }
  0x6d   : > { %s654_s30 = sshll.u32 %s743_s29, 4  ;;  %s655_s30 = int_to_ptr.vmem [resolvable:$false] %s654_s30 }
  0x6e   : > { %p652_p13 = pnand %p651_p3, %p815_p9  ;;  %s656_s21 = scalar_lea.vmem %s655_s30, 256 }
  0x6f   : > { %p657_p12 = scmp.lt.s32.totalorder %s904_s7, %s655_s30  ;;  %p658_p6 = scmp.lt.s32.totalorder %s656_s21, %s650_s8 }
  0x70   : > { %p653_p5 = pneg %p652_p13 }
  0x71   : > { %p659_p7 = por %p658_p6, %p657_p12 }
  0x73   : > { %p660_p1 = pnand %p659_p7, %p653_p5 }
  0x75   : > { %663 = shalt.err (!%p660_p1)
}
  0x76   : > { %s664_s5 = scalar_lea.hbm %s902_s15, 128  ;;  %s668_s10 = scalar_lea.hbm %s974_s3, 256 }
  0x77   : > { %p665_p2 = scmp.ne.s32.totalorder %s902_s15, %s664_s5  ;;  %p669_p8 = scmp.lt.s32.totalorder %s902_s15, %s974_s3 }
  0x78   : > { %p670_p0 = scmp.lt.s32.totalorder %s668_s10, %s664_s5 }
  0x79   : > { %p666_p4 = pnand %p665_p2, %p815_p9 }
  0x7a   : > { %p671_p3 = por %p670_p0, %p669_p8 }
  0x7b   : > { %p667_p10 = pneg %p666_p4 }
  0x7d   : > { %p672_p13 = pnand %p671_p3, %p667_p10 }
  0x7f   : > { %675 = shalt.err (!%p672_p13)
}
  0x80   : > { %496 = dma.vmem_to_hbm [thread:$0]  (%p815_p9), %s904_s7, 128, %s902_s15, %s301_s6  }
  0x81 PF: > { %s341_s23 = sand.u32 1, %s718_s12   ;;  %p981_p5 = scmp.ge.s32.totalorder %s738_s17, 2 }
  0x82   : > { %s342_s4 = scalar_lea.sflag [#allocation4], %s341_s23 }
  0x83   : > { %p507_p12 = pnand %p981_p5, %p822_p11 }
  0x85   : > { %p508_p6 = pneg %p507_p12 }
  0x87   : > { %709 = dma.done.wait (%p508_p6), %s342_s4, 128  }
  0x88   : > { %711 = vsyncadd (%p508_p6), %s342_s4, 4294967168  ;;  %s351_s24 = scalar_lea.sflag [#allocation9], %s341_s23 }
  0x89   : > { %713 = dma.done.wait (%p508_p6), %s351_s24, 128  }
  0x8a   : > { %715 = vsyncadd (%p508_p6), %s351_s24, 4294967168  ;;  %s26_s17 = sadd.s32 1, %s738_s17   ;;  %s982_s12 = smov %s722_s13 }
  0x8b   : > { %p23_p7 = scmp.ge.s32.totalorder %s26_s17, 4   ;;  %s983_s13 = smov %s726_s14 }
  0x8c   : > { %s984_s14 = smov %s820_s26  ;;  %s985_s15 = smov %s734_s16 }
  0x8d   : > { %s986_s16 = smov %s988_s20  ;;  %25 = sbr.rel (!%p23_p7) target bundleno = 10 (0xa), region = 107 }
  0x92   :  { %356 = vsyncpa [#allocation3], 1 }
  0x93   :  { %358 = vsyncpa [#allocation3 + $0x1], 1 }
  0x94   :  { %359 = vsyncpa [#allocation6], 1 }
  0x95   :  { %361 = vsyncpa [#allocation6 + $0x1], 1 }
  0x96   :  { %362 = vsyncpa [#allocation4], 1 }
  0x97   :  { %364 = vsyncpa [#allocation4 + $0x1], 1 }
  0x98   :  { %365 = vsyncpa [#allocation9], 1 }
  0x99   :  { %367 = vsyncpa [#allocation9 + $0x1], 1 }

</bundles_post_ra>
